<compile_context>
chip_gen: v6e
topology: v6e:2x2x1
jax: 0.10.0
libtpu: 0.0.40
codegen_flags: <defaults>
</compile_context>

<pallas_src>
import functools
from typing import NamedTuple

import jax
import jax.numpy as jnp
from jax.experimental import pallas as pl
from jax.experimental.pallas import tpu as pltpu


def _round_up(x, m):
    return ((x + m - 1) // m) * m


class ACDims(NamedTuple):
    input_dim: int
    hidden_dim: int
    num_actions: int
    d_pad: int
    h_pad: int
    n_pad: int


def _actor_critic_kernel(x_ref, w1_ref, b1_ref, wh_ref, bh_ref, out_ref, *,
                         num_actions):
    # Shared trunk: ReLU(x @ W1 + b1). bf16 operands, f32 MXU accumulation.
    h = jnp.dot(x_ref[...], w1_ref[...],
                preferred_element_type=jnp.float32) + b1_ref[...]
    h = jnp.maximum(h, 0.0)

    # Fused heads: ONE MXU pass producing [value | actor_logits | zero-pad].
    h = h.astype(wh_ref.dtype)            # feed the MXU in the weights' dtype
    fused = jnp.dot(h, wh_ref[...],
                    preferred_element_type=jnp.float32) + bh_ref[...]

    col = jax.lax.broadcasted_iota(jnp.int32, fused.shape, 1)
    is_policy = jnp.logical_and(col >= 1, col < 1 + num_actions)

    # Numerically-stable softmax over the policy lanes only (value/pad -> -inf).
    masked = jnp.where(is_policy, fused, -jnp.inf)
    m = jnp.max(masked, axis=-1, keepdims=True)       # finite: num_actions >= 1
    e = jnp.exp(masked - m)                           # exp(-inf) == 0 on value/pad lanes
    denom = jnp.sum(e, axis=-1, keepdims=True)
    # EUP approximate reciprocal (separate issue slot) + Newton-Raphson refinement:
    # relative error is squared per step, so normalization holds to << 1e-5.
    r = pl.reciprocal(denom, approx=True)
    r = r * (2.0 - denom * r)
    r = r * (2.0 - denom * r)
    probs = e * r

    # Single lane-dense store: lane 0 = value, lanes 1..1+A = policy, rest = 0.
    out_ref[...] = jnp.where(col == 0, fused, probs).astype(out_ref.dtype)


def prepare_params(params, *, param_dtype=jnp.bfloat16):
    """One-time head fusion + padding to MXU/lane granularity.

    Call once at init (and after each optimizer step); reuse the result across
    forward calls so padded weight copies are NOT re-materialized per call.
    """
    w1, b1, wc2, bc2, wa2, ba2 = params
    D, H = w1.shape
    A = wa2.shape[1]
    assert A >= 1, "num_actions must be >= 1 (softmax over zero lanes is undefined)"
    N = 1 + A                                          # fused head width (value + actions)

    D_p = _round_up(D, 128)
    H_p = _round_up(H, 128)
    N_p = _round_up(N, 128)

    f32 = jnp.float32
    wh = jnp.concatenate([wc2, wa2], axis=1)           # (H, 1+A)
    bh = jnp.concatenate([bc2, ba2], axis=1)           # (1, 1+A)

    w1_p = jnp.zeros((D_p, H_p), param_dtype).at[:D, :H].set(w1.astype(param_dtype))
    b1_p = jnp.zeros((1, H_p), f32).at[:, :H].set(b1.astype(f32))
    wh_p = jnp.zeros((H_p, N_p), param_dtype).at[:H, :N].set(wh.astype(param_dtype))
    bh_p = jnp.zeros((1, N_p), f32).at[:, :N].set(bh.astype(f32))

    dims = ACDims(D, H, A, D_p, H_p, N_p)
    return (w1_p, b1_p, wh_p, bh_p), dims


@functools.partial(jax.jit, static_argnums=(2, 3, 4))
def _forward_impl(x, weights, dims, block_b, single_buffer_weights):
    w1_p, b1_p, wh_p, bh_p = weights
    B, D = x.shape
    assert D == dims.input_dim, "observation feature dim mismatch"
    D_p, H_p, N_p, A = dims.d_pad, dims.h_pad, dims.n_pad, dims.num_actions
    pdt = w1_p.dtype
    bpe = jnp.dtype(pdt).itemsize

    # ---- batch tiling ---------------------------------------------------
    ra = 16 if bpe < 4 else 8                     # packed-sublane row alignment
    B8 = _round_up(B, ra)
    tile_cap = max(ra, _round_up(block_b, ra))
    n_steps = -(-B8 // tile_cap)                  # cdiv
    if n_steps == 1 and B8 >= 2 * ra:
        n_steps = 2        # >=2 grid steps so "parallel" can use both v7x TensorCores
    Bt = _round_up(-(-B8 // n_steps), ra)
    B_p = Bt * n_steps                            # padding bounded by ~ra*n_steps rows

    # ---- activations: pad/convert only when actually needed --------------
    x_c = x.astype(pdt)
    if (B_p, D_p) != (B, D):
        x_c = jnp.pad(x_c, ((0, B_p - B), (0, D_p - D)))

    # ---- explicit VMEM budget --------------------------------------------
    w_buf = 1 if single_buffer_weights else 2
    need = (2 * Bt * D_p * bpe + 2 * Bt * N_p * 4
            + w_buf * (D_p * H_p * bpe + H_p * N_p * bpe + (H_p + N_p) * 4))
    vmem_limit = int(min(max(need + (2 << 20), 32 << 20), 64 << 20))

    def const_spec(shape):
        idx = lambda i: (0,) * len(shape)
        if single_buffer_weights:
            # Weights never change across the batch grid: single-buffer them so
            # they don't reserve 2x their size in VMEM (critical on v7x 64 MiB).
            return pl.BlockSpec(shape, idx, pipeline_mode=pl.Buffered(1))
        return pl.BlockSpec(shape, idx)

    cost = pl.CostEstimate(
        flops=2 * B_p * (D_p * H_p + H_p * N_p),
        transcendentals=B_p * N_p,
        bytes_accessed=(B_p * D_p * bpe + D_p * H_p * bpe + H_p * N_p * bpe
                        + (H_p + N_p) * 4 + B_p * N_p * 4),
    )

    out = pl.pallas_call(
        functools.partial(_actor_critic_kernel, num_actions=A),
        out_shape=jax.ShapeDtypeStruct((B_p, N_p), jnp.float32),
        grid=(n_steps,),
        in_specs=[
            pl.BlockSpec((Bt, D_p), lambda i: (i, 0)),   # activations: tiled over batch
            const_spec((D_p, H_p)),                      # trunk weight (resident)
            const_spec((1, H_p)),                        # trunk bias
            const_spec((H_p, N_p)),                      # fused head weight
            const_spec((1, N_p)),                        # fused head bias
        ],
        out_specs=pl.BlockSpec((Bt, N_p), lambda i: (i, 0)),
        compiler_params=pltpu.CompilerParams(
            dimension_semantics=("parallel",),           # shard batch across TCs on v7x
            vmem_limit_bytes=vmem_limit,
        ),
        cost_estimate=cost,
    )(x_c, w1_p, b1_p, wh_p, bh_p)

    value = out[:B, 0:1]
    policy = out[:B, 1:1 + A]
    return value, policy


def actor_critic_forward(x, prepared, *, block_b=512):
    """x: (B, input_dim). prepared = prepare_params(params). Returns (value, policy)."""
    weights, dims = prepared
    try:
        return _forward_impl(x, weights, dims, int(block_b), True)
    except Exception:
        # Fallback if this jax version rejects pl.Buffered(1) single-buffering.
        return _forward_impl(x, weights, dims, int(block_b), False)


def init_params(key, input_dim, hidden_dims, num_actions):
    """Deterministic init mimicking nn.Linear's U(-1/sqrt(fan_in), 1/sqrt(fan_in)).
    Weights stored pre-transposed as (in, out)."""
    ks = jax.random.split(key, 6)

    def lin(kw, kb, fan_in, fan_out):
        bound = 1.0 / jnp.sqrt(jnp.float32(fan_in))
        w = jax.random.uniform(kw, (fan_in, fan_out), jnp.float32, -bound, bound)
        b = jax.random.uniform(kb, (1, fan_out), jnp.float32, -bound, bound)
        return w, b

    w1, b1 = lin(ks[0], ks[1], input_dim, hidden_dims)        # critic_linear1
    wc2, bc2 = lin(ks[2], ks[3], hidden_dims, 1)              # critic_linear2
    wa2, ba2 = lin(ks[4], ks[5], hidden_dims, num_actions)    # actor_linear2
    # actor_linear1 is unused in forward -> not materialized.
    return (w1, b1, wc2, bc2, wa2, ba2)


def ref_forward(x, params):
    """Pure-JAX f32 reference of the PyTorch forward."""
    w1, b1, wc2, bc2, wa2, ba2 = params
    h = jnp.maximum(x @ w1 + b1, 0.0)
    value = h @ wc2 + bc2
    policy = jax.nn.softmax(h @ wa2 + ba2, axis=-1)
    return value, policy


def ref_forward_quantized(x, params, param_dtype):
    """Reference matching the kernel's bf16-operand / f32-accumulate arithmetic."""
    w1, b1, wc2, bc2, wa2, ba2 = params
    f32 = jnp.float32
    q = lambda a: a.astype(param_dtype).astype(f32)
    h = jnp.maximum(q(x) @ q(w1) + b1, 0.0)
    h = q(h)
    value = h @ q(wc2) + bc2
    policy = jax.nn.softmax(h @ q(wa2) + ba2, axis=-1)
    return value, policy


if __name__ == "__main__":
    key = jax.random.PRNGKey(0)
    B, input_dim, hidden_dims, num_actions = 8, 16, 32, 8

    k_obs, k_params = jax.random.split(key)
    observation = jax.random.normal(k_obs, (B, input_dim), jnp.float32)
    params = init_params(k_params, input_dim, hidden_dims, num_actions)

    # One-time: fuse heads + pad weights (hoisted out of the per-step path).
    prepared = prepare_params(params, param_dtype=jnp.bfloat16)

    value, policy = actor_critic_forward(observation, prepared)
    jax.block_until_ready((value, policy))

    # Shapes and softmax normalization.
    assert value.shape == (B, 1)
    assert policy.shape == (B, num_actions)
    assert bool(jnp.allclose(jnp.sum(policy, axis=-1), 1.0, atol=1e-5))

    # Tight check vs. a reference using the same bf16-operand / f32-accumulate math.
    v_q, p_q = ref_forward_quantized(observation, params, jnp.bfloat16)
    assert bool(jnp.allclose(value, v_q, atol=5e-3, rtol=5e-3))
    assert bool(jnp.allclose(policy, p_q, atol=5e-3, rtol=5e-3))

    # Loose check vs. the exact f32 reference (bf16 weight rounding tolerance).
    v_ref, p_ref = ref_forward(observation, params)
    assert bool(jnp.allclose(value, v_ref, atol=5e-2, rtol=5e-2))
    assert bool(jnp.allclose(policy, p_ref, atol=5e-2, rtol=5e-2))

    # TODO(synk): the Adam optimizer / training step of the PyTorch module is not
    # part of the forward pass and is not implemented here.
    print("KERNEL_OK")
</pallas_src>

<mosaic_0001>
module attributes {stable_mosaic.version = 11 : i64} {
  func.func @_actor_critic_kernel(%arg0: i32, %arg1: memref<16x128xbf16, #tpu.memory_space<vmem>>, %arg2: memref<128x128xbf16, #tpu.memory_space<vmem>>, %arg3: memref<1x128xf32, #tpu.memory_space<vmem>>, %arg4: memref<128x128xbf16, #tpu.memory_space<vmem>>, %arg5: memref<1x128xf32, #tpu.memory_space<vmem>>, %arg6: memref<16x128xf32, #tpu.memory_space<vmem>>) attributes {dimension_semantics = [#tpu.dimension_semantics<parallel>], iteration_bounds = array<i64: 1>, scalar_prefetch = 0 : i64, scratch_operands = 0 : i64, tpu.core_type = #tpu.core_type<tc>, window_params = [{transform_indices = @transform_0, window_bounds = array<i64: 16, 128>}, {pipeline_mode = #tpu.pipeline_mode<synchronous>, transform_indices = @transform_1, window_bounds = array<i64: 128, 128>}, {pipeline_mode = #tpu.pipeline_mode<synchronous>, transform_indices = @transform_2, window_bounds = array<i64: 1, 128>}, {pipeline_mode = #tpu.pipeline_mode<synchronous>, transform_indices = @transform_3, window_bounds = array<i64: 128, 128>}, {pipeline_mode = #tpu.pipeline_mode<synchronous>, transform_indices = @transform_4, window_bounds = array<i64: 1, 128>}, {transform_indices = @transform_5, window_bounds = array<i64: 16, 128>}]} {
    %c0 = arith.constant 0 : index
    %c0_0 = arith.constant 0 : index
    %0 = vector.load %arg1[%c0, %c0_0] : memref<16x128xbf16, #tpu.memory_space<vmem>>, vector<16x128xbf16>
    %c0_1 = arith.constant 0 : index
    %c0_2 = arith.constant 0 : index
    %1 = vector.load %arg2[%c0_1, %c0_2] : memref<128x128xbf16, #tpu.memory_space<vmem>>, vector<128x128xbf16>
    %cst = arith.constant dense<0.000000e+00> : vector<16x128xf32>
    %2 = tpu.matmul %0, %1, %cst {dimension_numbers = #tpu.dot_dimension_numbers<[1], [0], [0], [1], [0, 0, 1, 1], [], []>} : vector<16x128xbf16>, vector<128x128xbf16>, vector<16x128xf32> -> vector<16x128xf32>
    %c0_3 = arith.constant 0 : index
    %c0_4 = arith.constant 0 : index
    %3 = vector.load %arg3[%c0_3, %c0_4] : memref<1x128xf32, #tpu.memory_space<vmem>>, vector<1x128xf32>
    %4 = vector.broadcast %3 : vector<1x128xf32> to vector<16x128xf32>
    %5 = arith.addf %2, %4 : vector<16x128xf32>
    %cst_5 = arith.constant 0.000000e+00 : f32
    %6 = vector.broadcast %cst_5 : f32 to vector<16x128xf32>
    %7 = arith.maximumf %5, %6 : vector<16x128xf32>
    %8 = arith.truncf %7 : vector<16x128xf32> to vector<16x128xbf16>
    %c0_6 = arith.constant 0 : index
    %c0_7 = arith.constant 0 : index
    %9 = vector.load %arg4[%c0_6, %c0_7] : memref<128x128xbf16, #tpu.memory_space<vmem>>, vector<128x128xbf16>
    %cst_8 = arith.constant dense<0.000000e+00> : vector<16x128xf32>
    %10 = tpu.matmul %8, %9, %cst_8 {dimension_numbers = #tpu.dot_dimension_numbers<[1], [0], [0], [1], [0, 0, 1, 1], [], []>} : vector<16x128xbf16>, vector<128x128xbf16>, vector<16x128xf32> -> vector<16x128xf32>
    %c0_9 = arith.constant 0 : index
    %c0_10 = arith.constant 0 : index
    %11 = vector.load %arg5[%c0_9, %c0_10] : memref<1x128xf32, #tpu.memory_space<vmem>>, vector<1x128xf32>
    %12 = vector.broadcast %11 : vector<1x128xf32> to vector<16x128xf32>
    %13 = arith.addf %10, %12 : vector<16x128xf32>
    %14 = tpu.iota {dimensions = array<i32: 1>} : vector<16x128xi32>
    %c1_i32 = arith.constant 1 : i32
    %15 = vector.broadcast %c1_i32 : i32 to vector<16x128xi32>
    %16 = arith.cmpi sge, %14, %15 : vector<16x128xi32>
    %c9_i32 = arith.constant 9 : i32
    %17 = vector.broadcast %c9_i32 : i32 to vector<16x128xi32>
    %18 = arith.cmpi slt, %14, %17 : vector<16x128xi32>
    %19 = arith.andi %16, %18 : vector<16x128xi1>
    %cst_11 = arith.constant 0xFF800000 : f32
    %20 = vector.broadcast %cst_11 : f32 to vector<16x128xf32>
    %21 = arith.select %19, %13, %20 : vector<16x128xi1>, vector<16x128xf32>
    %cst_12 = arith.constant dense<0xFF800000> : vector<16xf32>
    %22 = vector.multi_reduction <maximumf>, %21, %cst_12 [1] : vector<16x128xf32> to vector<16xf32>
    %23 = vector.shape_cast %22 : vector<16xf32> to vector<16x1xf32>
    %24 = vector.broadcast %23 : vector<16x1xf32> to vector<16x128xf32>
    %25 = arith.subf %21, %24 : vector<16x128xf32>
    %26 = math.exp %25 : vector<16x128xf32>
    %cst_13 = arith.constant dense<0.000000e+00> : vector<16xf32>
    %27 = vector.multi_reduction <add>, %26, %cst_13 [1] : vector<16x128xf32> to vector<16xf32>
    %28 = vector.shape_cast %27 : vector<16xf32> to vector<16x1xf32>
    %29 = tpu.reciprocal %28 {approx = true} : vector<16x1xf32> -> vector<16x1xf32>
    %30 = arith.mulf %28, %29 : vector<16x1xf32>
    %cst_14 = arith.constant 2.000000e+00 : f32
    %31 = vector.broadcast %cst_14 : f32 to vector<16x1xf32>
    %32 = arith.subf %31, %30 : vector<16x1xf32>
    %33 = arith.mulf %29, %32 : vector<16x1xf32>
    %34 = arith.mulf %28, %33 : vector<16x1xf32>
    %cst_15 = arith.constant 2.000000e+00 : f32
    %35 = vector.broadcast %cst_15 : f32 to vector<16x1xf32>
    %36 = arith.subf %35, %34 : vector<16x1xf32>
    %37 = arith.mulf %33, %36 : vector<16x1xf32>
    %38 = vector.broadcast %37 : vector<16x1xf32> to vector<16x128xf32>
    %39 = arith.mulf %26, %38 : vector<16x128xf32>
    %c0_i32 = arith.constant 0 : i32
    %40 = vector.broadcast %c0_i32 : i32 to vector<16x128xi32>
    %41 = arith.cmpi eq, %14, %40 : vector<16x128xi32>
    %42 = arith.select %41, %13, %39 : vector<16x128xi1>, vector<16x128xf32>
    %c0_16 = arith.constant 0 : index
    %c0_17 = arith.constant 0 : index
    %43 = vector.load %arg6[%c0_16, %c0_17] : memref<16x128xf32, #tpu.memory_space<vmem>>, vector<16x128xf32>
    tpu.vector_store %arg6[%c0_16, %c0_17], %42 {strides = array<i32>} : memref<16x128xf32, #tpu.memory_space<vmem>>, vector<16x128xf32>,
    return
  }
  func.func @transform_0(%arg0: i32) -> (i32, i32) {
    %c0_i32 = arith.constant 0 : i32
    %c0_i32_0 = arith.constant 0 : i32
    return %arg0, %c0_i32 : i32, i32
  }
  func.func @transform_1(%arg0: i32) -> (i32, i32) {
    %c0_i32 = arith.constant 0 : i32
    %c0_i32_0 = arith.constant 0 : i32
    %c0_i32_1 = arith.constant 0 : i32
    return %c0_i32, %c0_i32_0 : i32, i32
  }
  func.func @transform_2(%arg0: i32) -> (i32, i32) {
    %c0_i32 = arith.constant 0 : i32
    %c0_i32_0 = arith.constant 0 : i32
    %c0_i32_1 = arith.constant 0 : i32
    return %c0_i32, %c0_i32_0 : i32, i32
  }
  func.func @transform_3(%arg0: i32) -> (i32, i32) {
    %c0_i32 = arith.constant 0 : i32
    %c0_i32_0 = arith.constant 0 : i32
    %c0_i32_1 = arith.constant 0 : i32
    return %c0_i32, %c0_i32_0 : i32, i32
  }
  func.func @transform_4(%arg0: i32) -> (i32, i32) {
    %c0_i32 = arith.constant 0 : i32
    %c0_i32_0 = arith.constant 0 : i32
    %c0_i32_1 = arith.constant 0 : i32
    return %c0_i32, %c0_i32_0 : i32, i32
  }
  func.func @transform_5(%arg0: i32) -> (i32, i32) {
    %c0_i32 = arith.constant 0 : i32
    %c0_i32_0 = arith.constant 0 : i32
    return %arg0, %c0_i32 : i32, i32
  }
}

module attributes {stable_mosaic.version = 11 : i64} {
  func.func @_actor_critic_kernel(%arg0: i32, %arg1: memref<16x128xbf16, #tpu.memory_space<vmem>>, %arg2: memref<128x128xbf16, #tpu.memory_space<vmem>>, %arg3: memref<1x128xf32, #tpu.memory_space<vmem>>, %arg4: memref<128x128xbf16, #tpu.memory_space<vmem>>, %arg5: memref<1x128xf32, #tpu.memory_space<vmem>>, %arg6: memref<16x128xf32, #tpu.memory_space<vmem>>) attributes {dimension_semantics = [#tpu.dimension_semantics<parallel>], iteration_bounds = array<i64: 1>, scalar_prefetch = 0 : i64, scratch_operands = 0 : i64, tpu.core_type = #tpu.core_type<tc>, window_params = [{transform_indices = @transform_0, window_bounds = array<i64: 16, 128>}, {pipeline_mode = #tpu.pipeline_mode<synchronous>, transform_indices = @transform_1, window_bounds = array<i64: 128, 128>}, {pipeline_mode = #tpu.pipeline_mode<synchronous>, transform_indices = @transform_2, window_bounds = array<i64: 1, 128>}, {pipeline_mode = #tpu.pipeline_mode<synchronous>, transform_indices = @transform_3, window_bounds = array<i64: 128, 128>}, {pipeline_mode = #tpu.pipeline_mode<synchronous>, transform_indices = @transform_4, window_bounds = array<i64: 1, 128>}, {transform_indices = @transform_5, window_bounds = array<i64: 16, 128>}]} {
    %c0 = arith.constant 0 : index
    %c0_0 = arith.constant 0 : index
    %0 = vector.load %arg1[%c0, %c0_0] : memref<16x128xbf16, #tpu.memory_space<vmem>>, vector<16x128xbf16>
    %c0_1 = arith.constant 0 : index
    %c0_2 = arith.constant 0 : index
    %1 = vector.load %arg2[%c0_1, %c0_2] : memref<128x128xbf16, #tpu.memory_space<vmem>>, vector<128x128xbf16>
    %cst = arith.constant dense<0.000000e+00> : vector<16x128xf32>
    %2 = tpu.matmul %0, %1, %cst {dimension_numbers = #tpu.dot_dimension_numbers<[1], [0], [0], [1], [0, 0, 1, 1], [], []>} : vector<16x128xbf16>, vector<128x128xbf16>, vector<16x128xf32> -> vector<16x128xf32>
    %c0_3 = arith.constant 0 : index
    %c0_4 = arith.constant 0 : index
    %3 = vector.load %arg3[%c0_3, %c0_4] : memref<1x128xf32, #tpu.memory_space<vmem>>, vector<1x128xf32>
    %4 = vector.broadcast %3 : vector<1x128xf32> to vector<16x128xf32>
    %5 = arith.addf %2, %4 : vector<16x128xf32>
    %cst_5 = arith.constant 0.000000e+00 : f32
    %6 = vector.broadcast %cst_5 : f32 to vector<16x128xf32>
    %7 = arith.maximumf %5, %6 : vector<16x128xf32>
    %8 = arith.truncf %7 : vector<16x128xf32> to vector<16x128xbf16>
    %c0_6 = arith.constant 0 : index
    %c0_7 = arith.constant 0 : index
    %9 = vector.load %arg4[%c0_6, %c0_7] : memref<128x128xbf16, #tpu.memory_space<vmem>>, vector<128x128xbf16>
    %cst_8 = arith.constant dense<0.000000e+00> : vector<16x128xf32>
    %10 = tpu.matmul %8, %9, %cst_8 {dimension_numbers = #tpu.dot_dimension_numbers<[1], [0], [0], [1], [0, 0, 1, 1], [], []>} : vector<16x128xbf16>, vector<128x128xbf16>, vector<16x128xf32> -> vector<16x128xf32>
    %c0_9 = arith.constant 0 : index
    %c0_10 = arith.constant 0 : index
    %11 = vector.load %arg5[%c0_9, %c0_10] : memref<1x128xf32, #tpu.memory_space<vmem>>, vector<1x128xf32>
    %12 = vector.broadcast %11 : vector<1x128xf32> to vector<16x128xf32>
    %13 = arith.addf %10, %12 : vector<16x128xf32>
    %14 = tpu.iota {dimensions = array<i32: 1>} : vector<16x128xi32>
    %c1_i32 = arith.constant 1 : i32
    %15 = vector.broadcast %c1_i32 : i32 to vector<16x128xi32>
    %16 = arith.cmpi sge, %14, %15 : vector<16x128xi32>
    %c9_i32 = arith.constant 9 : i32
    %17 = vector.broadcast %c9_i32 : i32 to vector<16x128xi32>
    %18 = arith.cmpi slt, %14, %17 : vector<16x128xi32>
    %19 = arith.andi %16, %18 : vector<16x128xi1>
    %cst_11 = arith.constant 0xFF800000 : f32
    %20 = vector.broadcast %cst_11 : f32 to vector<16x128xf32>
    %21 = arith.select %19, %13, %20 : vector<16x128xi1>, vector<16x128xf32>
    %cst_12 = arith.constant dense<0xFF800000> : vector<16xf32>
    %22 = vector.multi_reduction <maximumf>, %21, %cst_12 [1] : vector<16x128xf32> to vector<16xf32>
    %23 = vector.shape_cast %22 : vector<16xf32> to vector<16x1xf32>
    %24 = vector.broadcast %23 : vector<16x1xf32> to vector<16x128xf32>
    %25 = arith.subf %21, %24 : vector<16x128xf32>
    %26 = math.exp %25 : vector<16x128xf32>
    %cst_13 = arith.constant dense<0.000000e+00> : vector<16xf32>
    %27 = vector.multi_reduction <add>, %26, %cst_13 [1] : vector<16x128xf32> to vector<16xf32>
    %28 = vector.shape_cast %27 : vector<16xf32> to vector<16x1xf32>
    %29 = tpu.reciprocal %28 {approx = true} : vector<16x1xf32> -> vector<16x1xf32>
    %30 = arith.mulf %28, %29 : vector<16x1xf32>
    %cst_14 = arith.constant 2.000000e+00 : f32
    %31 = vector.broadcast %cst_14 : f32 to vector<16x1xf32>
    %32 = arith.subf %31, %30 : vector<16x1xf32>
    %33 = arith.mulf %29, %32 : vector<16x1xf32>
    %34 = arith.mulf %28, %33 : vector<16x1xf32>
    %cst_15 = arith.constant 2.000000e+00 : f32
    %35 = vector.broadcast %cst_15 : f32 to vector<16x1xf32>
    %36 = arith.subf %35, %34 : vector<16x1xf32>
    %37 = arith.mulf %33, %36 : vector<16x1xf32>
    %38 = vector.broadcast %37 : vector<16x1xf32> to vector<16x128xf32>
    %39 = arith.mulf %26, %38 : vector<16x128xf32>
    %c0_i32 = arith.constant 0 : i32
    %40 = vector.broadcast %c0_i32 : i32 to vector<16x128xi32>
    %41 = arith.cmpi eq, %14, %40 : vector<16x128xi32>
    %42 = arith.select %41, %13, %39 : vector<16x128xi1>, vector<16x128xf32>
    %c0_16 = arith.constant 0 : index
    %c0_17 = arith.constant 0 : index
    %43 = vector.load %arg6[%c0_16, %c0_17] : memref<16x128xf32, #tpu.memory_space<vmem>>, vector<16x128xf32>
    tpu.vector_store %arg6[%c0_16, %c0_17], %42 {strides = array<i32>} : memref<16x128xf32, #tpu.memory_space<vmem>>, vector<16x128xf32>,
    return
  }
  func.func @transform_0(%arg0: i32) -> (i32, i32) {
    %c0_i32 = arith.constant 0 : i32
    %c0_i32_0 = arith.constant 0 : i32
    return %arg0, %c0_i32 : i32, i32
  }
  func.func @transform_1(%arg0: i32) -> (i32, i32) {
    %c0_i32 = arith.constant 0 : i32
    %c0_i32_0 = arith.constant 0 : i32
    %c0_i32_1 = arith.constant 0 : i32
    return %c0_i32, %c0_i32_0 : i32, i32
  }
  func.func @transform_2(%arg0: i32) -> (i32, i32) {
    %c0_i32 = arith.constant 0 : i32
    %c0_i32_0 = arith.constant 0 : i32
    %c0_i32_1 = arith.constant 0 : i32
    return %c0_i32, %c0_i32_0 : i32, i32
  }
  func.func @transform_3(%arg0: i32) -> (i32, i32) {
    %c0_i32 = arith.constant 0 : i32
    %c0_i32_0 = arith.constant 0 : i32
    %c0_i32_1 = arith.constant 0 : i32
    return %c0_i32, %c0_i32_0 : i32, i32
  }
  func.func @transform_4(%arg0: i32) -> (i32, i32) {
    %c0_i32 = arith.constant 0 : i32
    %c0_i32_0 = arith.constant 0 : i32
    %c0_i32_1 = arith.constant 0 : i32
    return %c0_i32, %c0_i32_0 : i32, i32
  }
  func.func @transform_5(%arg0: i32) -> (i32, i32) {
    %c0_i32 = arith.constant 0 : i32
    %c0_i32_0 = arith.constant 0 : i32
    return %arg0, %c0_i32 : i32, i32
  }
}

</mosaic_0001>

<bundles_post_ra>
// kernel: _forward_impl.1
= control target key start
LH: loop header
LB: loop body
LE: loop exit
PB: predicated region body
PF: predicated region fallthrough
CT: control target
= control target key end

     0   :  { %10 = vsyncpa [#allocation3], 0  ;;  %s541_s0 = inlined_call_operand.vmem [shape: bf16[16,128], index: 0, kind: input, shape index: {}]   ;;  %s542_s1 = inlined_call_operand.hbm [shape: bf16[128,128], index: 1, kind: input, shape index: {}]   ;;  %s543_s2 = inlined_call_operand.vmem [shape: f32[1,128], index: 2, kind: input, shape index: {}]   ;;  %s544_s3 = inlined_call_operand.hbm [shape: bf16[128,128], index: 3, kind: input, shape index: {}]   ;;  %s545_s4 = inlined_call_operand.vmem [shape: f32[1,128], index: 4, kind: input, shape index: {}]   ;;  %s546_s5 = inlined_call_operand.vmem [shape: f32[16,128], index: 5, kind: output, shape index: {}]  }
   0x1   :  { %11 = vsyncpa [#allocation5], 0  ;;  %s484_s18 = smov [#allocation2]  }
   0x2   :  { %s19_s19 = sshll.u32 %s484_s18, 4  ;;  %s20_s19 = int_to_ptr.vmem [resolvable:$true] %s19_s19 }
   0x3   :  { %s448_s20 = scalar_lea.vmem %s20_s19, 1024  ;;  %p453_p1 = scmp.lt.s32.totalorder %s20_s19, %s20_s19 }
   0x4   :  { %p449_p0 = scmp.ne.s32.totalorder %s20_s19, %s448_s20  ;;  %p454_p2 = scmp.lt.s32.totalorder %s448_s20, %s448_s20 }
   0x6   :  { %p455_p3 = por %p454_p2, %p453_p1 }
   0x8   :  { %p456_p4 = pnand %p455_p3, %p449_p0 }
   0xa   :  { %459 = shalt.err (!%p456_p4)
}
   0xb   :  { %s485_s21 = smov 64   ;;  %s486_s22 = smov 4  }
   0xc   :  { %25 = dma.hbm_to_vmem [thread:$0]  %s542_s1, 1024, %s20_s19, [#allocation3], %s485_s21, %s485_s21, %s486_s22  }
   0xd   :  { %s487_s25 = smov [#allocation4]  }
   0xe   :  { %s33_s26 = sshll.u32 %s487_s25, 4  ;;  %s34_s26 = int_to_ptr.vmem [resolvable:$true] %s33_s26 }
   0xf   :  { %s468_s27 = scalar_lea.vmem %s34_s26, 1024  ;;  %p473_p6 = scmp.lt.s32.totalorder %s34_s26, %s34_s26 }
  0x10   :  { %p469_p5 = scmp.ne.s32.totalorder %s34_s26, %s468_s27  ;;  %p474_p7 = scmp.lt.s32.totalorder %s468_s27, %s468_s27 }
  0x12   :  { %p475_p8 = por %p474_p7, %p473_p6 }
  0x14   :  { %p476_p9 = pnand %p475_p8, %p469_p5 }
  0x16   :  { %479 = shalt.err (!%p476_p9)
}
  0x17   :  { %39 = dma.hbm_to_vmem [thread:$0]  %s544_s3, 1024, %s34_s26, [#allocation5], %s485_s21, %s485_s21, %s486_s22  }
  0x18   :  { %480 = dma.done.wait [#allocation3], 1024  }
  0x19   :  { %481 = vsyncadd [#allocation3], 4294966272 }
  0x1a   :  { %482 = dma.done.wait [#allocation5], 1024  }
  0x1b   :  { %483 = vsyncadd [#allocation5], 4294966272  ;;  %v488_v0 = vmov 0.0   ;;  %vm489_vm0 = vmmov 0   ;;  %v415_v1 = vld [vmem:[#allocation2 + $0x38] sm:$0xff]   ;;  %v416_v2 = vld [vmem:[#allocation2 + $0x30] sm:$0xff]   ;;  %v284_v28 = vlaneseq }
  0x1c   :  { %369 = vmatprep.subr.bf16.mxu0 %v488_v0  ;;  %385 = vmatprep.mubr.msk.bf16.mxu0 %vm489_vm0, %v488_v0  ;;  %v417_v3 = vld [vmem:[#allocation2 + $0x28] sm:$0xff]   ;;  %v424_v4 = vld [vmem:[#allocation4 + $0x38] sm:$0xff]   ;;  %v418_v5 = vld [vmem:[#allocation2 + $0x20] sm:$0xff]  }
  0x1d   :  { %389 = vmatprep.subr.bf16.mxu1 %v488_v0  ;;  %405 = vmatprep.mubr.msk.bf16.mxu1 %vm489_vm0, %v488_v0  ;;  %v425_v6 = vld [vmem:[#allocation4 + $0x30] sm:$0xff]   ;;  %v419_v7 = vld [vmem:[#allocation2 + $0x18] sm:$0xff]   ;;  %v426_v8 = vld [vmem:[#allocation4 + $0x28] sm:$0xff]   ;;  %v285_v29 = vand.u32 127, %v284_v28 }
  0x1e   :  { %370 = vmatpush3.bf16.msra.mxu0 %v415_v1  ;;  %390 = vmatpush3.bf16.msra.mxu1 %v424_v4  ;;  %v420_v9 = vld [vmem:[#allocation2 + $0x10] sm:$0xff]   ;;  %v427_v10 = vld [vmem:[#allocation4 + $0x20] sm:$0xff]   ;;  %v421_v11 = vld [vmem:[#allocation2 + $0x8] sm:$0xff]  }
  0x1f   :  { %371 = vmatprep.subr.bf16.mxu0 %v488_v0  ;;  %391 = vmatprep.subr.bf16.mxu1 %v488_v0  ;;  %v428_v12 = vld [vmem:[#allocation4 + $0x18] sm:$0xff]   ;;  %v422_v13 = vld [vmem:[#allocation2] sm:$0xff]   ;;  %v429_v15 = vld [vmem:[#allocation4 + $0x10] sm:$0xff]   ;;  %vm286_vm1 = vcmp.ge.s32.totalorder %v285_v29, 1  ;;  %vm287_vm2 = vcmp.lt.s32.totalorder %v285_v29, 9  ;;  %vm321_vm4 = vcmp.eq.s32.totalorder %v285_v29, 0 }
  0x20   :  { %v423_v14 = vld [vmem:[%s541_s0] sm:$0xff]   ;;  %v430_v16 = vld [vmem:[#allocation4 + $0x8] sm:$0xff]   ;;  %vm288_vm3 = vmand %vm286_vm1, %vm287_vm2 }
  0x21   :  { %v431_v17 = vld [vmem:[#allocation4] sm:$0xff]  }
  0x22   :  { %372 = vmatpush3.bf16.msra.mxu0 %v416_v2  ;;  %392 = vmatpush3.bf16.msra.mxu1 %v425_v6  ;;  %v332_v18 = vld [vmem:[%s543_s2] ss:$0 sm:$0xff] }
  0x23   :  { %373 = vmatprep.subr.bf16.mxu0 %v488_v0  ;;  %393 = vmatprep.subr.bf16.mxu1 %v488_v0  ;;  %v342_v30 = vld [vmem:[%s545_s4] ss:$0 sm:$0xff] }
  0x26   :  { %374 = vmatpush3.bf16.msra.mxu0 %v417_v3  ;;  %394 = vmatpush3.bf16.msra.mxu1 %v426_v8 }
  0x27   :  { %375 = vmatprep.subr.bf16.mxu0 %v488_v0  ;;  %395 = vmatprep.subr.bf16.mxu1 %v488_v0 }
  0x2a   :  { %376 = vmatpush3.bf16.msra.mxu0 %v418_v5  ;;  %396 = vmatpush3.bf16.msra.mxu1 %v427_v10 }
  0x2b   :  { %377 = vmatprep.subr.bf16.mxu0 %v488_v0  ;;  %397 = vmatprep.subr.bf16.mxu1 %v488_v0 }
  0x2e   :  { %378 = vmatpush3.bf16.msra.mxu0 %v419_v7  ;;  %398 = vmatpush3.bf16.msra.mxu1 %v428_v12 }
  0x2f   :  { %379 = vmatprep.subr.bf16.mxu0 %v488_v0  ;;  %399 = vmatprep.subr.bf16.mxu1 %v488_v0 }
  0x32   :  { %380 = vmatpush3.bf16.msra.mxu0 %v420_v9  ;;  %400 = vmatpush3.bf16.msra.mxu1 %v429_v15 }
  0x33   :  { %381 = vmatprep.subr.bf16.mxu0 %v488_v0  ;;  %401 = vmatprep.subr.bf16.mxu1 %v488_v0 }
  0x36   :  { %382 = vmatpush3.bf16.msra.mxu0 %v421_v11  ;;  %402 = vmatpush3.bf16.msra.mxu1 %v430_v16 }
  0x37   :  { %383 = vmatprep.subr.bf16.mxu0 %v488_v0  ;;  %403 = vmatprep.subr.bf16.mxu1 %v488_v0 }
  0x3a   :  { %384 = vmatpush3.bf16.msra.mxu0 %v422_v13  ;;  %404 = vmatpush3.bf16.msra.mxu1 %v431_v17 }
  0x3d   :  { %386 = vmatmul.mubr.bf16.vlgmr.msra.gmra.mxu0 %v423_v14 }
  0xfd   :  { %v162_v19 = vpop.f32.mrf.mxu0 }
  0xfe   :  { %v163_v21 = vadd.f32 %v332_v18, %v162_v19 }
  0xff   :  { %v387_v20 = vpop.f32.mrf.mxu0 }
 0x100   :  { %v169_v25 = vmax.f32 %v163_v21, 0.0 }
 0x101   :  { %v165_v22 = vpop.f32.mrf.mxu0 }
 0x102   :  { %v166_v23 = vadd.f32 %v332_v18, %v165_v22 }
 0x103   :  { %v388_v24 = vpop.f32.mrf.mxu0 }
 0x104   :  { %v170_v26 = vmax.f32 %v166_v23, 0.0 }
 0x106   :  { %v171_v27 = vpack.c.bf16 %v170_v26, %v169_v25 }
 0x108   :  { %406 = vmatmul.mubr.bf16.vlgmr.msra.gmra.mxu1 %v171_v27 }
 0x1c8   :  { %v277_v31 = vpop.f32.mrf.mxu1 }
 0x1c9   :  { %v278_v32 = vadd.f32 %v342_v30, %v277_v31 }
 0x1ca   :  { %v407_v33 = vpop.f32.mrf.mxu1 }
 0x1cb   :  { %v289_v34 = vsel %vm288_vm3, %v278_v32, -inf }
 0x1cc   :  { %291 = vmax.xlane.f32.xlu0 %v289_v34  ;;  %v280_v35 = vpop.f32.mrf.mxu1 }
 0x1cd   :  { %v281_v36 = vadd.f32 %v342_v30, %v280_v35 }
 0x1ce   :  { %v408_v37 = vpop.f32.mrf.mxu1 }
 0x1cf   :  { %v290_v38 = vsel %vm288_vm3, %v281_v36, -inf }
 0x1d0   :  { %293 = vmax.xlane.f32.xlu0 %v290_v38 }
 0x255   :  { %v292_v39 = vpop.xlane.xlu0 %291 }
 0x256   :  { %v295_v40 = vsub.f32 %v289_v34, %v292_v39 }
 0x258   :  { %v297_v41 = vmul.f32 1.442695, %v295_v40 }
 0x259   :  { %v294_v42 = vpop.xlane.xlu0 %293 }
 0x25a   :  { %432 = vpow2.f32 %v297_v41  ;;  %v296_v43 = vsub.f32 %v290_v38, %v294_v42 }
 0x25c   :  { %v299_v44 = vmul.f32 1.442695, %v296_v43 }
 0x25e   :  { %434 = vpow2.f32 %v299_v44 }
 0x267   :  { %v433_v45 = vpop.eup %432 }
 0x268   :  { %301 = vadd.xlane.f32.xlu1 %v433_v45 }
 0x26b   :  { %v435_v46 = vpop.eup %434 }
 0x26c   :  { %303 = vadd.xlane.f32.xlu1 %v435_v46 }
 0x2f1   :  { %v302_v47 = vpop.xlane.xlu1 %301 }
 0x2f2   :  { %436 = vrcp.f32 %v302_v47 }
 0x2f5   :  { %v304_v48 = vpop.xlane.xlu1 %303 }
 0x2f6   :  { %438 = vrcp.f32 %v304_v48 }
 0x2ff   :  { %v437_v49 = vpop.eup %436 }
 0x300   :  { %v307_v50 = vmul.f32 %v437_v49, %v302_v47 }
 0x302   :  { %v309_v51 = vsub.f32 2.0, %v307_v50 }
 0x303   :  { %v439_v52 = vpop.eup %438 }
 0x304   :  { %v311_v53 = vmul.f32 %v437_v49, %v309_v51  ;;  %v308_v54 = vmul.f32 %v439_v52, %v304_v48 }
 0x306   :  { %v313_v55 = vmul.f32 %v311_v53, %v302_v47  ;;  %v310_v56 = vsub.f32 2.0, %v308_v54 }
 0x308   :  { %v315_v57 = vsub.f32 2.0, %v313_v55  ;;  %v312_v58 = vmul.f32 %v439_v52, %v310_v56 }
 0x30a   :  { %v317_v59 = vmul.f32 %v315_v57, %v311_v53  ;;  %v314_v60 = vmul.f32 %v312_v58, %v304_v48 }
 0x30c   :  { %v319_v61 = vmul.f32 %v433_v45, %v317_v59  ;;  %v316_v62 = vsub.f32 2.0, %v314_v60 }
 0x30e   :  { %v322_v63 = vsel %vm321_vm4, %v278_v32, %v319_v61  ;;  %v318_v0 = vmul.f32 %v316_v62, %v312_v58 }
 0x30f   :  { %324 = vst [vmem:[%s546_s5] sm:$0xff] %v322_v63 }
 0x310   :  { %v320_v1 = vmul.f32 %v435_v46, %v318_v0 }
 0x312   :  { %v323_v2 = vsel %vm321_vm4, %v281_v36, %v320_v1 }
 0x313   :  { %325 = vst [vmem:[%s546_s5 + $0x8] sm:$0xff] %v323_v2 }
 0x314   :  { %330 = vsyncpa [#allocation3], 1 }
 0x315   :  { %331 = vsyncpa [#allocation5], 1 }

// kernel: _forward_impl.1
= control target key start
LH: loop header
LB: loop body
LE: loop exit
PB: predicated region body
PF: predicated region fallthrough
CT: control target
= control target key end

     0   :  { %10 = vsyncpa [#allocation3], 0  ;;  %s541_s0 = inlined_call_operand.vmem [shape: bf16[16,128], index: 0, kind: input, shape index: {}]   ;;  %s542_s1 = inlined_call_operand.hbm [shape: bf16[128,128], index: 1, kind: input, shape index: {}]   ;;  %s543_s2 = inlined_call_operand.vmem [shape: f32[1,128], index: 2, kind: input, shape index: {}]   ;;  %s544_s3 = inlined_call_operand.hbm [shape: bf16[128,128], index: 3, kind: input, shape index: {}]   ;;  %s545_s4 = inlined_call_operand.vmem [shape: f32[1,128], index: 4, kind: input, shape index: {}]   ;;  %s546_s5 = inlined_call_operand.vmem [shape: f32[16,128], index: 5, kind: output, shape index: {}]  }
   0x1   :  { %11 = vsyncpa [#allocation5], 0  ;;  %s484_s18 = smov [#allocation2]  }
   0x2   :  { %s19_s19 = sshll.u32 %s484_s18, 4  ;;  %s20_s19 = int_to_ptr.vmem [resolvable:$true] %s19_s19 }
   0x3   :  { %s448_s20 = scalar_lea.vmem %s20_s19, 1024  ;;  %p453_p1 = scmp.lt.s32.totalorder %s20_s19, %s20_s19 }
   0x4   :  { %p449_p0 = scmp.ne.s32.totalorder %s20_s19, %s448_s20  ;;  %p454_p2 = scmp.lt.s32.totalorder %s448_s20, %s448_s20 }
   0x6   :  { %p455_p3 = por %p454_p2, %p453_p1 }
   0x8   :  { %p456_p4 = pnand %p455_p3, %p449_p0 }
   0xa   :  { %459 = shalt.err (!%p456_p4)
}
   0xb   :  { %s485_s21 = smov 64   ;;  %s486_s22 = smov 4  }
   0xc   :  { %25 = dma.hbm_to_vmem [thread:$0]  %s542_s1, 1024, %s20_s19, [#allocation3], %s485_s21, %s485_s21, %s486_s22  }
   0xd   :  { %s487_s25 = smov [#allocation4]  }
   0xe   :  { %s33_s26 = sshll.u32 %s487_s25, 4  ;;  %s34_s26 = int_to_ptr.vmem [resolvable:$true] %s33_s26 }
   0xf   :  { %s468_s27 = scalar_lea.vmem %s34_s26, 1024  ;;  %p473_p6 = scmp.lt.s32.totalorder %s34_s26, %s34_s26 }
  0x10   :  { %p469_p5 = scmp.ne.s32.totalorder %s34_s26, %s468_s27  ;;  %p474_p7 = scmp.lt.s32.totalorder %s468_s27, %s468_s27 }
  0x12   :  { %p475_p8 = por %p474_p7, %p473_p6 }
  0x14   :  { %p476_p9 = pnand %p475_p8, %p469_p5 }
  0x16   :  { %479 = shalt.err (!%p476_p9)
}
  0x17   :  { %39 = dma.hbm_to_vmem [thread:$0]  %s544_s3, 1024, %s34_s26, [#allocation5], %s485_s21, %s485_s21, %s486_s22  }
  0x18   :  { %480 = dma.done.wait [#allocation3], 1024  }
  0x19   :  { %481 = vsyncadd [#allocation3], 4294966272 }
  0x1a   :  { %482 = dma.done.wait [#allocation5], 1024  }
  0x1b   :  { %483 = vsyncadd [#allocation5], 4294966272  ;;  %v488_v0 = vmov 0.0   ;;  %vm489_vm0 = vmmov 0   ;;  %v415_v1 = vld [vmem:[#allocation2 + $0x38] sm:$0xff]   ;;  %v416_v2 = vld [vmem:[#allocation2 + $0x30] sm:$0xff]   ;;  %v284_v28 = vlaneseq }
  0x1c   :  { %369 = vmatprep.subr.bf16.mxu0 %v488_v0  ;;  %385 = vmatprep.mubr.msk.bf16.mxu0 %vm489_vm0, %v488_v0  ;;  %v417_v3 = vld [vmem:[#allocation2 + $0x28] sm:$0xff]   ;;  %v424_v4 = vld [vmem:[#allocation4 + $0x38] sm:$0xff]   ;;  %v418_v5 = vld [vmem:[#allocation2 + $0x20] sm:$0xff]  }
  0x1d   :  { %389 = vmatprep.subr.bf16.mxu1 %v488_v0  ;;  %405 = vmatprep.mubr.msk.bf16.mxu1 %vm489_vm0, %v488_v0  ;;  %v425_v6 = vld [vmem:[#allocation4 + $0x30] sm:$0xff]   ;;  %v419_v7 = vld [vmem:[#allocation2 + $0x18] sm:$0xff]   ;;  %v426_v8 = vld [vmem:[#allocation4 + $0x28] sm:$0xff]   ;;  %v285_v29 = vand.u32 127, %v284_v28 }
  0x1e   :  { %370 = vmatpush3.bf16.msra.mxu0 %v415_v1  ;;  %390 = vmatpush3.bf16.msra.mxu1 %v424_v4  ;;  %v420_v9 = vld [vmem:[#allocation2 + $0x10] sm:$0xff]   ;;  %v427_v10 = vld [vmem:[#allocation4 + $0x20] sm:$0xff]   ;;  %v421_v11 = vld [vmem:[#allocation2 + $0x8] sm:$0xff]  }
  0x1f   :  { %371 = vmatprep.subr.bf16.mxu0 %v488_v0  ;;  %391 = vmatprep.subr.bf16.mxu1 %v488_v0  ;;  %v428_v12 = vld [vmem:[#allocation4 + $0x18] sm:$0xff]   ;;  %v422_v13 = vld [vmem:[#allocation2] sm:$0xff]   ;;  %v429_v15 = vld [vmem:[#allocation4 + $0x10] sm:$0xff]   ;;  %vm286_vm1 = vcmp.ge.s32.totalorder %v285_v29, 1  ;;  %vm287_vm2 = vcmp.lt.s32.totalorder %v285_v29, 9  ;;  %vm321_vm4 = vcmp.eq.s32.totalorder %v285_v29, 0 }
  0x20   :  { %v423_v14 = vld [vmem:[%s541_s0] sm:$0xff]   ;;  %v430_v16 = vld [vmem:[#allocation4 + $0x8] sm:$0xff]   ;;  %vm288_vm3 = vmand %vm286_vm1, %vm287_vm2 }
  0x21   :  { %v431_v17 = vld [vmem:[#allocation4] sm:$0xff]  }
  0x22   :  { %372 = vmatpush3.bf16.msra.mxu0 %v416_v2  ;;  %392 = vmatpush3.bf16.msra.mxu1 %v425_v6  ;;  %v332_v18 = vld [vmem:[%s543_s2] ss:$0 sm:$0xff] }
  0x23   :  { %373 = vmatprep.subr.bf16.mxu0 %v488_v0  ;;  %393 = vmatprep.subr.bf16.mxu1 %v488_v0  ;;  %v342_v30 = vld [vmem:[%s545_s4] ss:$0 sm:$0xff] }
  0x26   :  { %374 = vmatpush3.bf16.msra.mxu0 %v417_v3  ;;  %394 = vmatpush3.bf16.msra.mxu1 %v426_v8 }
  0x27   :  { %375 = vmatprep.subr.bf16.mxu0 %v488_v0  ;;  %395 = vmatprep.subr.bf16.mxu1 %v488_v0 }
  0x2a   :  { %376 = vmatpush3.bf16.msra.mxu0 %v418_v5  ;;  %396 = vmatpush3.bf16.msra.mxu1 %v427_v10 }
  0x2b   :  { %377 = vmatprep.subr.bf16.mxu0 %v488_v0  ;;  %397 = vmatprep.subr.bf16.mxu1 %v488_v0 }
  0x2e   :  { %378 = vmatpush3.bf16.msra.mxu0 %v419_v7  ;;  %398 = vmatpush3.bf16.msra.mxu1 %v428_v12 }
  0x2f   :  { %379 = vmatprep.subr.bf16.mxu0 %v488_v0  ;;  %399 = vmatprep.subr.bf16.mxu1 %v488_v0 }
  0x32   :  { %380 = vmatpush3.bf16.msra.mxu0 %v420_v9  ;;  %400 = vmatpush3.bf16.msra.mxu1 %v429_v15 }
  0x33   :  { %381 = vmatprep.subr.bf16.mxu0 %v488_v0  ;;  %401 = vmatprep.subr.bf16.mxu1 %v488_v0 }
  0x36   :  { %382 = vmatpush3.bf16.msra.mxu0 %v421_v11  ;;  %402 = vmatpush3.bf16.msra.mxu1 %v430_v16 }
  0x37   :  { %383 = vmatprep.subr.bf16.mxu0 %v488_v0  ;;  %403 = vmatprep.subr.bf16.mxu1 %v488_v0 }
  0x3a   :  { %384 = vmatpush3.bf16.msra.mxu0 %v422_v13  ;;  %404 = vmatpush3.bf16.msra.mxu1 %v431_v17 }
  0x3d   :  { %386 = vmatmul.mubr.bf16.vlgmr.msra.gmra.mxu0 %v423_v14 }
  0xfd   :  { %v162_v19 = vpop.f32.mrf.mxu0 }
  0xfe   :  { %v163_v21 = vadd.f32 %v332_v18, %v162_v19 }
  0xff   :  { %v387_v20 = vpop.f32.mrf.mxu0 }
 0x100   :  { %v169_v25 = vmax.f32 %v163_v21, 0.0 }
 0x101   :  { %v165_v22 = vpop.f32.mrf.mxu0 }
 0x102   :  { %v166_v23 = vadd.f32 %v332_v18, %v165_v22 }
 0x103   :  { %v388_v24 = vpop.f32.mrf.mxu0 }
 0x104   :  { %v170_v26 = vmax.f32 %v166_v23, 0.0 }
 0x106   :  { %v171_v27 = vpack.c.bf16 %v170_v26, %v169_v25 }
 0x108   :  { %406 = vmatmul.mubr.bf16.vlgmr.msra.gmra.mxu1 %v171_v27 }
 0x1c8   :  { %v277_v31 = vpop.f32.mrf.mxu1 }
 0x1c9   :  { %v278_v32 = vadd.f32 %v342_v30, %v277_v31 }
 0x1ca   :  { %v407_v33 = vpop.f32.mrf.mxu1 }
 0x1cb   :  { %v289_v34 = vsel %vm288_vm3, %v278_v32, -inf }
 0x1cc   :  { %291 = vmax.xlane.f32.xlu0 %v289_v34  ;;  %v280_v35 = vpop.f32.mrf.mxu1 }
 0x1cd   :  { %v281_v36 = vadd.f32 %v342_v30, %v280_v35 }
 0x1ce   :  { %v408_v37 = vpop.f32.mrf.mxu1 }
 0x1cf   :  { %v290_v38 = vsel %vm288_vm3, %v281_v36, -inf }
 0x1d0   :  { %293 = vmax.xlane.f32.xlu0 %v290_v38 }
 0x255   :  { %v292_v39 = vpop.xlane.xlu0 %291 }
 0x256   :  { %v295_v40 = vsub.f32 %v289_v34, %v292_v39 }
 0x258   :  { %v297_v41 = vmul.f32 1.442695, %v295_v40 }
 0x259   :  { %v294_v42 = vpop.xlane.xlu0 %293 }
 0x25a   :  { %432 = vpow2.f32 %v297_v41  ;;  %v296_v43 = vsub.f32 %v290_v38, %v294_v42 }
 0x25c   :  { %v299_v44 = vmul.f32 1.442695, %v296_v43 }
 0x25e   :  { %434 = vpow2.f32 %v299_v44 }
 0x267   :  { %v433_v45 = vpop.eup %432 }
 0x268   :  { %301 = vadd.xlane.f32.xlu1 %v433_v45 }
 0x26b   :  { %v435_v46 = vpop.eup %434 }
 0x26c   :  { %303 = vadd.xlane.f32.xlu1 %v435_v46 }
 0x2f1   :  { %v302_v47 = vpop.xlane.xlu1 %301 }
 0x2f2   :  { %436 = vrcp.f32 %v302_v47 }
 0x2f5   :  { %v304_v48 = vpop.xlane.xlu1 %303 }
 0x2f6   :  { %438 = vrcp.f32 %v304_v48 }
 0x2ff   :  { %v437_v49 = vpop.eup %436 }
 0x300   :  { %v307_v50 = vmul.f32 %v437_v49, %v302_v47 }
 0x302   :  { %v309_v51 = vsub.f32 2.0, %v307_v50 }
 0x303   :  { %v439_v52 = vpop.eup %438 }
 0x304   :  { %v311_v53 = vmul.f32 %v437_v49, %v309_v51  ;;  %v308_v54 = vmul.f32 %v439_v52, %v304_v48 }
 0x306   :  { %v313_v55 = vmul.f32 %v311_v53, %v302_v47  ;;  %v310_v56 = vsub.f32 2.0, %v308_v54 }
 0x308   :  { %v315_v57 = vsub.f32 2.0, %v313_v55  ;;  %v312_v58 = vmul.f32 %v439_v52, %v310_v56 }
 0x30a   :  { %v317_v59 = vmul.f32 %v315_v57, %v311_v53  ;;  %v314_v60 = vmul.f32 %v312_v58, %v304_v48 }
 0x30c   :  { %v319_v61 = vmul.f32 %v433_v45, %v317_v59  ;;  %v316_v62 = vsub.f32 2.0, %v314_v60 }
 0x30e   :  { %v322_v63 = vsel %vm321_vm4, %v278_v32, %v319_v61  ;;  %v318_v0 = vmul.f32 %v316_v62, %v312_v58 }
 0x30f   :  { %324 = vst [vmem:[%s546_s5] sm:$0xff] %v322_v63 }
 0x310   :  { %v320_v1 = vmul.f32 %v435_v46, %v318_v0 }
 0x312   :  { %v323_v2 = vsel %vm321_vm4, %v281_v36, %v320_v1 }
 0x313   :  { %325 = vst [vmem:[%s546_s5 + $0x8] sm:$0xff] %v323_v2 }
 0x314   :  { %330 = vsyncpa [#allocation3], 1 }
 0x315   :  { %331 = vsyncpa [#allocation5], 1 }

</bundles_post_ra>
